<compile_context>
chip_gen: v7x
topology: tpu7x:2x2x1
jax: 0.10.0
libtpu: 0.0.40
codegen_flags: <defaults>
</compile_context>

<pallas_src>
import math

import jax
import jax.numpy as jnp
from jax.experimental import pallas as pl
from jax.experimental.pallas import tpu as pltpu

_LANE = 128
_SUBLANE = 8


def _ffn_kernel(x_ref, w1_ref, b1_ref, w2_ref, b2_ref, o_ref, acc_ref):
    # x_ref:  (TM, d_model)            w1_ref: (d_model, TF)   b1_ref: (1, TF) f32
    # w2_ref: (TF, d_model)            b2_ref: (1, d_model) f32
    # o_ref:  (TM, d_model) out dtype  acc_ref: (TM, d_model) f32 reduction carry
    k = pl.program_id(1)

    x = x_ref[...].astype(jnp.bfloat16)
    # Linear 1 (this d_ff slice) + bias + ReLU; f32 accumulation on the MXU.
    h = jnp.dot(x, w1_ref[...].astype(jnp.bfloat16),
                preferred_element_type=jnp.float32)
    h = jnp.maximum(h + b1_ref[...], 0.0)
    # Dropout: identity (eval/inference mode).
    # TODO(synk): training-mode stochastic dropout (pltpu.prng_seed /
    # prng_random_bits keep-mask with 1/(1-p) scaling on h) not implemented.

    # Partial contribution of this d_ff slice to Linear 2.
    contrib = jnp.dot(h.astype(jnp.bfloat16), w2_ref[...].astype(jnp.bfloat16),
                      preferred_element_type=jnp.float32)

    @pl.when(k == 0)
    def _():
        # First slice: overwrite (saves a zero-fill + reload) and fold in b2.
        acc_ref[...] = contrib + b2_ref[...]

    @pl.when(k > 0)
    def _():
        acc_ref[...] += contrib

    @pl.when(k == pl.num_programs(1) - 1)
    def _():
        o_ref[...] = acc_ref[...].astype(o_ref.dtype)


def _round_up(x, m):
    return (x + m - 1) // m * m


def _physical_vmem_bytes():
    """Best-effort per-core physical VMEM size (bytes)."""
    try:
        info = pltpu.get_tpu_info()
        v = getattr(info, "vmem_capacity_bytes", None)
        if v:
            return int(v)
    except Exception:
        pass
    try:
        kind = jax.devices()[0].device_kind.lower()
        if "v2" in kind or "v3" in kind:
            return 16 * 1024 * 1024
        if "v5" in kind or "v6" in kind:
            return 128 * 1024 * 1024
    except Exception:
        pass
    return 64 * 1024 * 1024  # conservative (covers v7x's 64 MiB per TC)


def _tile_vmem_bytes(tm, tf, d_model, x_b, w_b, out_b):
    """Estimated VMEM footprint of one grid step (double-buffered pipeline)."""
    x_buf = 2 * tm * d_model * x_b
    o_buf = 2 * tm * d_model * out_b
    w1_buf = 2 * d_model * tf * w_b
    w2_buf = 2 * tf * d_model * w_b
    bias_buf = 2 * (tf + d_model) * 4
    acc = tm * d_model * 4                    # f32 accumulator scratch
    h_tmp = tm * tf * (4 + 2)                 # f32 intermediate + bf16 copy
    return x_buf + o_buf + w1_buf + w2_buf + bias_buf + acc + h_tmp


def _select_tiling(M, d_model, d_ff, x_b, w_b, out_b, budget):
    """Pick (TM, TF): TF a multiple of 128 (or all of a small d_ff), TM as
    large as the VMEM budget allows (amortizes weight re-streaming)."""
    if d_ff <= _LANE:
        tf_cands = [d_ff]                     # full-dim block (allowed)
    else:
        tf_cands = [t for t in (512, 256, 128) if t <= _round_up(d_ff, _LANE)]
        if not tf_cands:
            tf_cands = [_LANE]
    tm_cands = (1024, 768, 512, 384, 256, 192, 128, 64, 32, 16, 8)
    m_cap = _round_up(M, _SUBLANE)
    for tf in tf_cands:
        for tm in tm_cands:
            tm_eff = min(tm, m_cap)
            if _tile_vmem_bytes(tm_eff, tf, d_model, x_b, w_b, out_b) <= budget:
                return tm_eff, tf
    return min(_SUBLANE, m_cap), tf_cands[-1]


def feed_forward_block(x, w1, b1, w2, b2, *, out_dtype=None):
    """x: (B, S, d_model). w1: (d_model, d_ff), b1: (d_ff,),
    w2: (d_ff, d_model), b2: (d_model,).  Pass weights in bf16 for best perf."""
    B, S, d_model = x.shape
    d_ff = w1.shape[1]
    M = B * S
    out_dtype = out_dtype or x.dtype

    x_b = jnp.dtype(x.dtype).itemsize
    w_b = jnp.dtype(w1.dtype).itemsize
    o_b = jnp.dtype(out_dtype).itemsize

    # Per-generation VMEM budget: ~105 MiB on v5e/v6e, ~53 MiB on v7x.
    phys_vmem = _physical_vmem_bytes()
    vmem_limit = int(phys_vmem * 0.82)
    TM, TF = _select_tiling(M, d_model, d_ff, x_b, w_b, o_b,
                            budget=int(vmem_limit * 0.9))

    # Guarantee >=2 token tiles so the "parallel" axis feeds both v7x cores.
    m_cap = _round_up(M, _SUBLANE)
    if pl.cdiv(m_cap, TM) < 2 and m_cap >= 2 * _SUBLANE:
        TM = _round_up(pl.cdiv(m_cap, 2), _SUBLANE)

    # Pad the hidden dim so TF stays (8,128)-aligned; zero-padded w1/b1 columns
    # give ReLU(0)=0 rows of h and the matching w2 rows are zero, so the
    # padded hidden units contribute nothing.
    d_ff_p = _round_up(d_ff, TF)
    if d_ff_p != d_ff:
        w1 = jnp.pad(w1, ((0, 0), (0, d_ff_p - d_ff)))
        w2 = jnp.pad(w2, ((0, d_ff_p - d_ff), (0, 0)))
        b1 = jnp.pad(b1, (0, d_ff_p - d_ff))

    n_i = pl.cdiv(M, TM)
    grid = (n_i, d_ff_p // TF)

    x2d = x.reshape(M, d_model)                       # no wrapper-side cast
    b1_2d = b1.reshape(1, d_ff_p).astype(jnp.float32)
    b2_2d = b2.reshape(1, d_model).astype(jnp.float32)

    flops = 4 * M * d_model * d_ff_p                  # two matmuls, 2*M*N*K each
    bytes_accessed = (
        M * d_model * x_b + M * d_model * o_b
        + n_i * (d_model * d_ff_p * w_b + d_ff_p * d_model * w_b)  # re-streamed
        + n_i * (d_ff_p + d_model) * 4)

    out2d = pl.pallas_call(
        _ffn_kernel,
        out_shape=jax.ShapeDtypeStruct((M, d_model), out_dtype),
        grid_spec=pltpu.PrefetchScalarGridSpec(
            num_scalar_prefetch=0,
            grid=grid,
            in_specs=[
                pl.BlockSpec((TM, d_model), lambda i, k: (i, 0)),   # x token tile
                pl.BlockSpec((d_model, TF), lambda i, k: (0, k)),   # w1 d_ff slice
                pl.BlockSpec((1, TF), lambda i, k: (0, k)),         # b1 d_ff slice
                pl.BlockSpec((TF, d_model), lambda i, k: (k, 0)),   # w2 d_ff slice
                pl.BlockSpec((1, d_model), lambda i, k: (0, 0)),    # b2 (resident)
            ],
            out_specs=pl.BlockSpec((TM, d_model), lambda i, k: (i, 0)),
            scratch_shapes=[pltpu.VMEM((TM, d_model), jnp.float32)],
        ),
        compiler_params=pltpu.CompilerParams(
            dimension_semantics=("parallel", "arbitrary"),
            vmem_limit_bytes=vmem_limit,
        ),
        cost_estimate=pl.CostEstimate(
            flops=flops, transcendentals=0, bytes_accessed=int(bytes_accessed)),
    )(x2d, w1, b1_2d, w2, b2_2d)
    return out2d.reshape(B, S, d_model)


def _init_linear_params(key, in_features, out_features):
    """Match nn.Linear default init: U(-1/sqrt(in), 1/sqrt(in)) for W and b."""
    kw, kb = jax.random.split(key)
    bound = 1.0 / math.sqrt(in_features)
    # stored as (in, out) == W.T relative to PyTorch's (out, in)
    w = jax.random.uniform(kw, (in_features, out_features), jnp.float32,
                           minval=-bound, maxval=bound)
    b = jax.random.uniform(kb, (out_features,), jnp.float32,
                           minval=-bound, maxval=bound)
    return w, b


if __name__ == "__main__":
    key = jax.random.PRNGKey(0)
    k_x, k_l1, k_l2 = jax.random.split(key, 3)

    batch, seq, d_model, d_ff = 2, 8, 32, 64
    dropout_p = 0.1  # identity at inference time

    x = jax.random.normal(k_x, (batch, seq, d_model), jnp.float32)
    w1, b1 = _init_linear_params(k_l1, d_model, d_ff)
    w2, b2 = _init_linear_params(k_l2, d_ff, d_model)

    # Weights stored persistently in bf16 (one-time conversion, not per call).
    w1_bf = w1.astype(jnp.bfloat16)
    w2_bf = w2.astype(jnp.bfloat16)

    out = feed_forward_block(x, w1_bf, b1, w2_bf, b2)
    out = jax.block_until_ready(out)

    # Reference in plain JAX (f32).  bf16 matmul operands in the kernel ->
    # relaxed tolerance.
    ref = jnp.maximum(x.reshape(-1, d_model) @ w1 + b1, 0.0) @ w2 + b2
    ref = ref.reshape(batch, seq, d_model)
    assert out.shape == (batch, seq, d_model)
    assert jnp.allclose(out, ref, atol=2e-2, rtol=2e-2), (
        float(jnp.max(jnp.abs(out - ref))))

    print("KERNEL_OK")
</pallas_src>

<mosaic_0001>
module attributes {stable_mosaic.version = 11 : i64} {
  func.func @_ffn_kernel(%arg0: i32, %arg1: i32, %arg2: memref<8x32xf32, #tpu.memory_space<vmem>>, %arg3: memref<32x64xbf16, #tpu.memory_space<vmem>>, %arg4: memref<1x64xf32, #tpu.memory_space<vmem>>, %arg5: memref<64x32xbf16, #tpu.memory_space<vmem>>, %arg6: memref<1x32xf32, #tpu.memory_space<vmem>>, %arg7: memref<8x32xf32, #tpu.memory_space<vmem>>, %arg8: memref<8x32xf32, #tpu.memory_space<vmem>>) attributes {dimension_semantics = [#tpu.dimension_semantics<parallel>, #tpu.dimension_semantics<arbitrary>], iteration_bounds = array<i64: 2, 1>, scalar_prefetch = 0 : i64, scratch_operands = 1 : i64, tpu.core_type = #tpu.core_type<tc>, window_params = [{transform_indices = @transform_0, window_bounds = array<i64: 8, 32>}, {transform_indices = @transform_1, window_bounds = array<i64: 32, 64>}, {transform_indices = @transform_2, window_bounds = array<i64: 1, 64>}, {transform_indices = @transform_3, window_bounds = array<i64: 64, 32>}, {pipeline_mode = #tpu.pipeline_mode<synchronous>, transform_indices = @transform_4, window_bounds = array<i64: 1, 32>}, {transform_indices = @transform_5, window_bounds = array<i64: 8, 32>}]} {
    %c0 = arith.constant 0 : index
    %c0_0 = arith.constant 0 : index
    %0 = vector.load %arg2[%c0, %c0_0] : memref<8x32xf32, #tpu.memory_space<vmem>>, vector<8x32xf32>
    %1 = arith.truncf %0 : vector<8x32xf32> to vector<8x32xbf16>
    %c0_1 = arith.constant 0 : index
    %c0_2 = arith.constant 0 : index
    %2 = vector.load %arg3[%c0_1, %c0_2] : memref<32x64xbf16, #tpu.memory_space<vmem>>, vector<32x64xbf16>
    %cst = arith.constant dense<0.000000e+00> : vector<8x64xf32>
    %3 = tpu.matmul %1, %2, %cst {dimension_numbers = #tpu.dot_dimension_numbers<[1], [0], [0], [1], [0, 0, 1, 1], [], []>} : vector<8x32xbf16>, vector<32x64xbf16>, vector<8x64xf32> -> vector<8x64xf32>
    %c0_3 = arith.constant 0 : index
    %c0_4 = arith.constant 0 : index
    %4 = vector.load %arg4[%c0_3, %c0_4] : memref<1x64xf32, #tpu.memory_space<vmem>>, vector<1x64xf32>
    %5 = vector.broadcast %4 : vector<1x64xf32> to vector<8x64xf32>
    %6 = arith.addf %3, %5 : vector<8x64xf32>
    %cst_5 = arith.constant 0.000000e+00 : f32
    %7 = vector.broadcast %cst_5 : f32 to vector<8x64xf32>
    %8 = arith.maximumf %6, %7 : vector<8x64xf32>
    %9 = arith.truncf %8 : vector<8x64xf32> to vector<8x64xbf16>
    %c0_6 = arith.constant 0 : index
    %c0_7 = arith.constant 0 : index
    %10 = vector.load %arg5[%c0_6, %c0_7] : memref<64x32xbf16, #tpu.memory_space<vmem>>, vector<64x32xbf16>
    %cst_8 = arith.constant dense<0.000000e+00> : vector<8x32xf32>
    %11 = tpu.matmul %9, %10, %cst_8 {dimension_numbers = #tpu.dot_dimension_numbers<[1], [0], [0], [1], [0, 0, 1, 1], [], []>} : vector<8x64xbf16>, vector<64x32xbf16>, vector<8x32xf32> -> vector<8x32xf32>
    %c0_i32 = arith.constant 0 : i32
    %12 = arith.cmpi eq, %arg1, %c0_i32 : i32
    %13 = arith.extui %12 : i1 to i32
    %c0_i32_9 = arith.constant 0 : i32
    %14 = arith.cmpi ne, %13, %c0_i32_9 : i32
    scf.if %14 {
      %c0_14 = arith.constant 0 : index
      %c0_15 = arith.constant 0 : index
      %21 = vector.load %arg6[%c0_14, %c0_15] : memref<1x32xf32, #tpu.memory_space<vmem>>, vector<1x32xf32>
      %22 = vector.broadcast %21 : vector<1x32xf32> to vector<8x32xf32>
      %23 = arith.addf %11, %22 : vector<8x32xf32>
      %c0_16 = arith.constant 0 : index
      %c0_17 = arith.constant 0 : index
      %24 = vector.load %arg8[%c0_16, %c0_17] : memref<8x32xf32, #tpu.memory_space<vmem>>, vector<8x32xf32>
      tpu.vector_store %arg8[%c0_16, %c0_17], %23 {strides = array<i32>} : memref<8x32xf32, #tpu.memory_space<vmem>>, vector<8x32xf32>,
    } else {
    }
    %c0_i32_10 = arith.constant 0 : i32
    %15 = arith.cmpi sgt, %arg1, %c0_i32_10 : i32
    %16 = arith.extui %15 : i1 to i32
    %c0_i32_11 = arith.constant 0 : i32
    %17 = arith.cmpi ne, %16, %c0_i32_11 : i32
    scf.if %17 {
      %c0_14 = arith.constant 0 : index
      %c0_15 = arith.constant 0 : index
      %21 = vector.load %arg8[%c0_14, %c0_15] : memref<8x32xf32, #tpu.memory_space<vmem>>, vector<8x32xf32>
      %22 = arith.addf %21, %11 : vector<8x32xf32>
      %c0_16 = arith.constant 0 : index
      %c0_17 = arith.constant 0 : index
      %23 = vector.load %arg8[%c0_16, %c0_17] : memref<8x32xf32, #tpu.memory_space<vmem>>, vector<8x32xf32>
      tpu.vector_store %arg8[%c0_16, %c0_17], %22 {strides = array<i32>} : memref<8x32xf32, #tpu.memory_space<vmem>>, vector<8x32xf32>,
    } else {
    }
    %c0_i32_12 = arith.constant 0 : i32
    %18 = arith.cmpi eq, %arg1, %c0_i32_12 : i32
    %19 = arith.extui %18 : i1 to i32
    %c0_i32_13 = arith.constant 0 : i32
    %20 = arith.cmpi ne, %19, %c0_i32_13 : i32
    scf.if %20 {
      %c0_14 = arith.constant 0 : index
      %c0_15 = arith.constant 0 : index
      %21 = vector.load %arg8[%c0_14, %c0_15] : memref<8x32xf32, #tpu.memory_space<vmem>>, vector<8x32xf32>
      %c0_16 = arith.constant 0 : index
      %c0_17 = arith.constant 0 : index
      %22 = vector.load %arg7[%c0_16, %c0_17] : memref<8x32xf32, #tpu.memory_space<vmem>>, vector<8x32xf32>
      tpu.vector_store %arg7[%c0_16, %c0_17], %21 {strides = array<i32>} : memref<8x32xf32, #tpu.memory_space<vmem>>, vector<8x32xf32>,
    } else {
    }
    return
  }
  func.func @transform_0(%arg0: i32, %arg1: i32) -> (i32, i32) {
    %c0_i32 = arith.constant 0 : i32
    %c0_i32_0 = arith.constant 0 : i32
    return %arg0, %c0_i32 : i32, i32
  }
  func.func @transform_1(%arg0: i32, %arg1: i32) -> (i32, i32) {
    %c0_i32 = arith.constant 0 : i32
    %c0_i32_0 = arith.constant 0 : i32
    return %c0_i32, %arg1 : i32, i32
  }
  func.func @transform_2(%arg0: i32, %arg1: i32) -> (i32, i32) {
    %c0_i32 = arith.constant 0 : i32
    %c0_i32_0 = arith.constant 0 : i32
    return %c0_i32, %arg1 : i32, i32
  }
  func.func @transform_3(%arg0: i32, %arg1: i32) -> (i32, i32) {
    %c0_i32 = arith.constant 0 : i32
    %c0_i32_0 = arith.constant 0 : i32
    return %arg1, %c0_i32 : i32, i32
  }
  func.func @transform_4(%arg0: i32, %arg1: i32) -> (i32, i32) {
    %c0_i32 = arith.constant 0 : i32
    %c0_i32_0 = arith.constant 0 : i32
    %c0_i32_1 = arith.constant 0 : i32
    return %c0_i32, %c0_i32_0 : i32, i32
  }
  func.func @transform_5(%arg0: i32, %arg1: i32) -> (i32, i32) {
    %c0_i32 = arith.constant 0 : i32
    %c0_i32_0 = arith.constant 0 : i32
    return %arg0, %c0_i32 : i32, i32
  }
}

</mosaic_0001>

<bundles_post_ra>
// kernel: tpu_custom_call.1
= control target key start
LH: loop header
LB: loop body
LE: loop exit
PB: predicated region body
PF: predicated region fallthrough
CT: control target
= control target key end

     0   :  { %10 = vsyncpa [#allocation4], 0  ;;  %s948_s0 = inlined_call_operand.vmem [shape: f32[16,32], index: 0, kind: input, shape index: {}]   ;;  %s949_s1 = inlined_call_operand.vmem [shape: bf16[32,64], index: 1, kind: input, shape index: {}]   ;;  %s950_s2 = inlined_call_operand.vmem [shape: f32[1,64], index: 2, kind: input, shape index: {}]   ;;  %s951_s3 = inlined_call_operand.vmem [shape: bf16[64,32], index: 3, kind: input, shape index: {}]   ;;  %s952_s4 = inlined_call_operand.vmem [shape: f32[1,32], index: 4, kind: input, shape index: {}]   ;;  %s953_s5 = inlined_call_operand.hbm [shape: f32[16,32], index: 5, kind: output, shape index: {}]  }
   0x1   :  { %12 = vsyncpa [#allocation4 + $0x1], 0  ;;  %s809_s18 = smov 0   ;;  %s811_s19 = smov 0  }
   0x2   :  { %s813_s20 = smov 0   ;;  %s815_s21 = smov 0  }
   0x3   :  { %s817_s22 = smov 0   ;;  %s819_s23 = smov 0  }
   0x4 LB: > { %s581_s24 = sadd.s32 4294967295, %s774_s23   ;;  %s582_s25 = sadd.s32 4294967294, %s774_s23   ;;  %s774_s23 = sphi %s819_s23, %s18_s23   ;;  %s770_s22 = sphi %s817_s22, %s960_s22   ;;  %s766_s21 = sphi %s815_s21, %s959_s21   ;;  %s762_s20 = sphi %s813_s20, %s958_s20   ;;  %s758_s19 = sphi %s811_s19, %s957_s19   ;;  %s754_s18 = sphi %s809_s18, %s956_s18  }
   0x5   : > { %s30_s26 = sadd.s32 1, %s770_s22  ;;  %s162_s27 = sadd.s32 1, %s762_s20 }
   0x6   : > { %p32_p0 = scmp.ge.s32.totalorder %s30_s26, 2  ;;  %p172_p1 = scmp.ne.s32.totalorder %s762_s20, %s758_s19 }
   0x7   : > { %p173_p2 = scmp.eq.s32.totalorder %s581_s24, 1  ;;  %p178_p3 = scmp.ne.s32.totalorder %s758_s19, %s754_s18 }
   0x8   : > { %s962_s26 = smov (%p32_p0, %s30_s26), 0  ;;  %p179_p5 = scmp.eq.s32.totalorder %s582_s25, 1 }
   0x9   : > { %p849_p4 = por %p173_p2, %p172_p1  ;;  %s159_s29 = ssub.s32 %s770_s22, %s962_s26 }
   0xa   : > { %p588_p6 = scmp.ge.s32.totalorder %s774_s23, 1  ;;  %p160_p7 = scmp.eq.s32.totalorder %s159_s29, 0 }
   0xb   : > { %p856_p8 = por %p179_p5, %p178_p3  ;;  %p229_p9 = scmp.lt.s32.totalorder %s774_s23, 3 }
   0xc   : > { %s862_s6 = scalar_select %p160_p7, %s762_s20, %s162_s27  }
   0xd   : > { %p230_p10 = pnand %p588_p6, %p229_p9 }
   0xe   : > { %v690_v0 = vld [vmem:[%s949_s1] sm:$0xff] (!%p230_p10)   ;;  %v776_v1 = vmov (!%p230_p10), 0.0   ;;  %v691_v2 = vld [vmem:[%s949_s1 + $0x8] sm:$0xff] (!%p230_p10)   ;;  %vm777_vm0 = vmmov (!%p230_p10), 0   ;;  %p268_p11 = scmp.lt.s32.totalorder (!%p230_p10), %s766_s21, 1  ;;  %vm311_vm1 = vcmask (!%p230_p10), 261120  }
   0xf   : > { %233 = sbr.rel (%p230_p10) target bundleno = 483 (0x1e3), region = 40  ;;  %613 = vmatprep.subr.bf16.mxu0 (!%p230_p10), %v776_v1  ;;  %621 = vmatprep.subr.bf16.mxu1 (!%p230_p10), %v776_v1  ;;  %v692_v3 = vld [vmem:[%s951_s3] sm:$0xff] (!%p230_p10)   ;;  %v693_v4 = vld [vmem:[%s951_s3 + $0x8] sm:$0xff] (!%p230_p10)   ;;  %v694_v7 = vld [vmem:[%s951_s3 + $0x10] sm:$0xff] (!%p230_p10)   ;;  %vm389_vm2 = vcmask (!%p230_p10), 523264   ;;  %s265_s11 = sand.u32 (!%p230_p10), 1, %s758_s19  }
  0x10   : > { %614 = vmatpush3.bf16.msra.mxu0 (!%p230_p10), %v690_v0  ;;  %617 = vmatprep.mubr.msk.bf16.mxu0 (!%p230_p10), %vm777_vm0, %v776_v1  ;;  %v695_v8 = vld [vmem:[%s951_s3 + $0x18] sm:$0xff] (!%p230_p10)   ;;  %v591_v9 = vld [vmem:[%s950_s2] ss:$0 sm:$0xff] (!%p230_p10)  ;;  %s589_s14 = sshll.u32 (!%p230_p10), %s265_s11, 3  ;;  %s602_s15 = sshll.u32 (!%p230_p10), %s766_s21, 7 }
  0x11   : > { %615 = vmatprep.subr.bf16.mxu0 (!%p230_p10), %v776_v1  ;;  %629 = vmatprep.mubr.msk.bf16.mxu1 (!%p230_p10), %vm777_vm0, %v776_v1  ;;  %v600_v17 = vld [vmem:[%s952_s4] ss:$0 sm:$0xff] (!%p230_p10)  ;;  %s900_s27 = scalar_lea.hbm (!%p230_p10), %s953_s5, %s602_s15  ;;  %s459_s29 = scalar_lea.sflag (!%p230_p10), [#allocation4], %s265_s11 }
  0x12   : > { %622 = vmatpush3.bf16.msra.mxu1 (!%p230_p10), %v692_v3 }
  0x13   : > { %623 = vmatprep.subr.bf16.mxu1 (!%p230_p10), %v776_v1 }
  0x14   : > { %616 = vmatpush3.bf16.msra.mxu0 (!%p230_p10), %v691_v2 }
  0x16   : > { %s269_s13 = scalar_select %p268_p11, %s766_s21, 1  ;;  %624 = vmatpush3.bf16.msra.mxu1 %v693_v4 }
  0x17   : > { %625 = vmatprep.subr.bf16.mxu1 %v776_v1  ;;  %s778_s21 = smov [#allocation3]  }
  0x18   : > { %s590_s16 = sshll.u32 %s269_s13, 3  ;;  %s700_s8 = sshll.u32 %s778_s21, 4  ;;  %s701_s8 = int_to_ptr.vmem [resolvable:$false] %s700_s8 }
  0x19   : > { %s271_s25 = scalar_lea.vmem %s948_s0, %s590_s16  ;;  %s267_s16 = scalar_lea.vmem [#allocation3], %s589_s14 }
  0x1a   : > { %v286_v5 = vld [vmem:[%s271_s25] sm:$0xff]  ;;  %626 = vmatpush3.bf16.msra.mxu1 %v694_v7  ;;  %s472_s17 = sshll.u32 %s267_s16, 4  ;;  %s702_s9 = scalar_lea.vmem %s701_s8, 256  ;;  %s902_s17 = int_to_ptr.vmem [resolvable:$true] %s472_s17 }
  0x1b   : > { %v287_v6 = vpack.c.bf16 %v286_v5, %v286_v5  ;;  %627 = vmatprep.subr.bf16.mxu1 %v776_v1  ;;  %s696_s7 = scalar_lea.vmem %s902_s17, 128  ;;  %p703_p1 = scmp.lt.s32.totalorder %s902_s17, %s701_s8 }
  0x1c   : > { %p697_p12 = scmp.ne.s32.totalorder %s902_s17, %s696_s7  ;;  %p704_p2 = scmp.lt.s32.totalorder %s702_s9, %s696_s7 }
  0x1d   : > { %618 = vmatmul.mubr.msk.bf16.vlgmr.msra.gmra.mrb[0].mxu0 %vm311_vm1, %v287_v6 }
  0x1e   : > { %628 = vmatpush3.bf16.msra.mxu1 %v695_v8  ;;  %p698_p13 = pnand %p697_p12, %p849_p4  ;;  %p705_p3 = por %p704_p2, %p703_p1 }
  0x20   : > { %p699_p0 = pneg %p698_p13 }
  0x22   : > { %p706_p5 = pnand %p705_p3, %p699_p0 }
  0xf0   : > { %v349_v10 = vpop.f32.mrb[0].mxu0 }
  0xf1   : > { %v350_v11 = vadd.f32 %v591_v9, %v349_v10  ;;  %v619_v12 = vpop.f32.mrb[1].mxu0 }
  0xf2   : > { %v352_v13 = vpop.f32.mrb[2].mxu0 }
  0xf3   : > { %v355_v14 = vmax.f32 %v350_v11, 0.0  ;;  %v620_v15 = vpop.f32.mrb[3].mxu0 }
  0xf5   : > { %v356_v16 = vpack.c.bf16 %v355_v14, %v355_v14 }
  0xf7   : > { %630 = vmatmul.mubr.msk.bf16.vlgmr.msra.gmra.mrb[0].mxu1 %vm389_vm2, %v356_v16 }
 0x1ca   : > { %v427_v18 = vpop.f32.mrb[0].mxu1 }
 0x1cb   : > { %v444_v19 = vadd.f32 %v600_v17, %v427_v18  ;;  %v631_v20 = vpop.f32.mrb[1].mxu1 }
 0x1cc   : > { %v430_v21 = vpop.f32.mrb[2].mxu1 }
 0x1cd   : > { %445 = vst.msk [vmem:[#allocation2] sm:$0xff] %vm311_vm1, %v444_v19  ;;  %v632_v22 = vpop.f32.mrb[3].mxu1 }
 0x1d4   : > { %v456_v23 = vld [vmem:[#allocation2] sm:$0xff] }
 0x1d5   : > { %457 = vst.msk [vmem:[%s267_s16] sm:$0xff] %vm311_vm1, %v456_v23 }
 0x1d6   : > { %709 = shalt.err (!%p706_p5)
}
 0x1d7   : > { %s710_s10 = scalar_lea.hbm %s900_s27, 128  ;;  %s714_s13 = scalar_lea.hbm %s953_s5, 256 }
 0x1d8   : > { %p711_p6 = scmp.ne.s32.totalorder %s900_s27, %s710_s10  ;;  %p715_p10 = scmp.lt.u32.totalorder %s900_s27, %s953_s5 }
 0x1d9   : > { %p716_p11 = scmp.lt.u32.totalorder %s714_s13, %s710_s10  ;;  %p718_p13 = scmp.lt.u32.totalorder %s710_s10, %s900_s27 }
 0x1da   : > { %p712_p7 = pnand %p711_p6, %p849_p4 }
 0x1db   : > { %p717_p12 = por %p716_p11, %p715_p10 }
 0x1dc   : > { %p713_p9 = pneg %p712_p7 }
 0x1dd   : > { %p719_p0 = por %p718_p13, %p717_p12 }
 0x1df   : > { %p720_p1 = pnand %p719_p0, %p713_p9 }
 0x1e1   : > { %723 = shalt.err (!%p720_p1)
}
 0x1e2   : > { %633 = dma.vmem_to_hbm [thread:$0]  (%p849_p4), %s902_s17, 128, %s900_s27, %s459_s29  }
 0x1e3 PF: > { %p639_p2 = scmp.ge.s32.totalorder %s774_s23, 2  ;;  %s484_s16 = sand.u32 1, %s754_s18  }
 0x1e4   : > { %s485_s24 = scalar_lea.sflag [#allocation4], %s484_s16 }
 0x1e5   : > { %p636_p3 = pnand %p639_p2, %p856_p8 }
 0x1e7   : > { %749 = dma.done.wait (!%p636_p3), %s485_s24, 128  }
 0x1e8   : > { %751 = vsyncadd (!%p636_p3), %s485_s24, 4294967168  ;;  %s18_s23 = sadd.s32 1, %s774_s23   ;;  %s956_s18 = smov %s758_s19 }
 0x1e9   : > { %p15_p5 = scmp.ge.s32.totalorder %s18_s23, 4   ;;  %s957_s19 = smov %s762_s20 }
 0x1ea   : > { %s958_s20 = smov %s862_s6  ;;  %s959_s21 = smov %s770_s22 }
 0x1eb   : > { %s960_s22 = smov %s962_s26  ;;  %17 = sbr.rel (!%p15_p5) target bundleno = 4 (0x4), region = 96 }
 0x1f2   :  { %490 = vsyncpa [#allocation4], 1 }
 0x1f3   :  { %492 = vsyncpa [#allocation4 + $0x1], 1 }

</bundles_post_ra>
